<compile_context>
chip_gen: v6e
topology: v6e:2x2x1
jax: 0.10.0
libtpu: 0.0.40
codegen_flags: <defaults>
</compile_context>

<pallas_src>
import jax
import jax.numpy as jnp
from jax.experimental import pallas as pl
from jax.experimental.pallas import tpu as pltpu


# ----------------------------------------------------------------------------
# Kernels
# ----------------------------------------------------------------------------
def _fused_ae_kernel(x_ref, m_ref, b_ref, out_ref):
    # x_ref:   (nb, C, T)  batch-slab of channels x spatial tile (NCHW-native)
    # m_ref:   (C, C)      fused encoder+decoder weight  M = W_dec @ G
    # b_ref:   (C, 1)      decoder bias (broadcast along the lane/spatial axis)
    # out_ref: (nb, C, T)  reconstructed tile
    m = m_ref[...]
    b = b_ref[...]
    for i in range(x_ref.shape[0]):           # nb is small & static -> unrolled
        rec = jnp.dot(m, x_ref[i], preferred_element_type=jnp.float32)
        out_ref[i] = (rec + b).astype(out_ref.dtype)


def _lowrank_ae_kernel(x_ref, g_ref, w_ref, b_ref, out_ref):
    # Low-rank two-step path for very large C (encoder then decoder in VMEM).
    # x_ref: (nb, C, T), g_ref: (R, C), w_ref: (C, R), b_ref: (C, 1)
    g = g_ref[...]
    w = w_ref[...]
    b = b_ref[...]
    for i in range(x_ref.shape[0]):
        enc = jnp.dot(g, x_ref[i], preferred_element_type=jnp.float32)   # (R, T)
        rec = jnp.dot(w, enc, preferred_element_type=jnp.float32)        # (C, T)
        out_ref[i] = (rec + b).astype(out_ref.dtype)


# ----------------------------------------------------------------------------
# Blocking heuristic (VMEM-budget aware, generation-safe)
# ----------------------------------------------------------------------------
def _choose_blocking(N, C, HW, *, vmem_budget_bytes=32 << 20,
                     tile_hw_cap=16384, max_nb=8):
    """Pick (nb, tile_hw) for blocks of shape (nb, C, tile_hw).

    Live data VMEM ~= 2 (double-buffer) * 2 (in+out) * nb * C * tile_hw * 4 B,
    kept under `vmem_budget_bytes` so the kernel fits v7x's 64 MiB VMEM with the
    48 MiB scoped limit set below (and v5e/v6e trivially).
    """
    bytes_per_lane = 16 * C                       # f32, double-buffered in + out
    lane_budget = max(128, vmem_budget_bytes // bytes_per_lane)
    tile_cap = min(lane_budget, tile_hw_cap)

    if HW <= tile_cap:
        # Whole spatial extent in one block (block dim == full array dim is
        # always layout-legal); fold several batch elements in so tiny images
        # don't pay one ~0.35us grid step per image.
        tile_hw = HW
        nb = int(max(1, min(N, max_nb, lane_budget // max(HW, 1))))
        while N % nb != 0:                        # keep batch blocks exact
            nb -= 1
    else:
        # Large images: biggest lane-dense (multiple-of-128) tile within budget;
        # the cdiv grid clips the (possibly partial) last block.
        tile_hw = max(128, (tile_cap // 128) * 128)
        nb = 1
    return nb, tile_hw


# ----------------------------------------------------------------------------
# Wrapper
# ----------------------------------------------------------------------------
def gaussian_autoencoder_forward(x_nchw, means, sigmas, w_dec, b_dec, *,
                                 force_path=None,
                                 vmem_budget_bytes=32 << 20,
                                 lowrank_channel_threshold=1024):
    """Forward pass of GaussianAutoEncoder.

    x_nchw : (N, C, H, W) float32
    means  : (R,)  gaussian centers in [0, 1]
    sigmas : (R,)  gaussian widths
    w_dec  : (C, R, 1, 1) decoder Conv2d weight (PyTorch layout)
    b_dec  : (C,)  decoder Conv2d bias
    force_path : None (auto) | "fused" | "lowrank"
    returns: (N, C, H, W) float32 reconstruction
    """
    N, C, H, W = x_nchw.shape
    R = means.shape[0]

    # ---- parameter glue (plain JAX; tiny) ----
    pos = (jnp.arange(C, dtype=jnp.float32) + 0.5) / C                       # (C,)
    g = jnp.exp(-0.5 * ((pos[None, :] - means[:, None]) / sigmas[:, None]) ** 2)
    g = g / jnp.sum(g, axis=1, keepdims=True)                                # (R, C)
    w_dec_mat = w_dec.reshape(C, R).astype(jnp.float32)                      # (C, R)
    b_col = b_dec.reshape(C, 1).astype(jnp.float32)                          # (C, 1)

    # ---- NCHW-native flatten (pure view, no HBM traffic) ----
    HW = H * W
    x_flat = x_nchw.reshape(N, C, HW)

    nb, tile_hw = _choose_blocking(N, C, HW, vmem_budget_bytes=vmem_budget_bytes)
    grid = (N // nb, pl.cdiv(HW, tile_hw))

    x_spec = pl.BlockSpec((nb, C, tile_hw), lambda n, j: (n, 0, j))
    out_spec = pl.BlockSpec((nb, C, tile_hw), lambda n, j: (n, 0, j))
    bias_spec = pl.BlockSpec((C, 1), lambda n, j: (0, 0))
    compiler_params = pltpu.CompilerParams(
        dimension_semantics=("parallel", "parallel"),
        vmem_limit_bytes=48 << 20,          # explicit; safe on v7x's 64 MiB VMEM
    )

    if force_path is None:
        use_lowrank = C > lowrank_channel_threshold
    else:
        use_lowrank = (force_path == "lowrank")

    if use_lowrank:
        out_flat = pl.pallas_call(
            _lowrank_ae_kernel,
            out_shape=jax.ShapeDtypeStruct((N, C, HW), jnp.float32),
            grid_spec=pltpu.PrefetchScalarGridSpec(
                num_scalar_prefetch=0,
                grid=grid,
                in_specs=[
                    x_spec,
                    pl.BlockSpec((R, C), lambda n, j: (0, 0)),   # encoder G
                    pl.BlockSpec((C, R), lambda n, j: (0, 0)),   # decoder W
                    bias_spec,
                ],
                out_specs=out_spec,
            ),
            compiler_params=compiler_params,
        )(x_flat, g, w_dec_mat, b_col)
    else:
        m_comb = (w_dec_mat @ g).astype(jnp.float32)                         # (C, C)
        out_flat = pl.pallas_call(
            _fused_ae_kernel,
            out_shape=jax.ShapeDtypeStruct((N, C, HW), jnp.float32),
            grid_spec=pltpu.PrefetchScalarGridSpec(
                num_scalar_prefetch=0,
                grid=grid,
                in_specs=[
                    x_spec,
                    pl.BlockSpec((C, C), lambda n, j: (0, 0)),   # fused weight
                    bias_spec,
                ],
                out_specs=out_spec,
            ),
            compiler_params=compiler_params,
        )(x_flat, m_comb, b_col)

    return out_flat.reshape(N, C, H, W)


# ----------------------------------------------------------------------------
# Pure-JAX reference (unfused two-step math, no Pallas) for validation
# ----------------------------------------------------------------------------
def _reference_forward(x_nchw, means, sigmas, w_dec, b_dec):
    N, C, H, W = x_nchw.shape
    R = means.shape[0]
    pos = (jnp.arange(C, dtype=jnp.float32) + 0.5) / C
    g = jnp.exp(-0.5 * ((pos[None, :] - means[:, None]) / sigmas[:, None]) ** 2)
    g = g / jnp.sum(g, axis=1, keepdims=True)                                # (R, C)
    x_pix = jnp.transpose(x_nchw, (0, 2, 3, 1)).reshape(-1, C)               # (P, C)
    enc = x_pix @ g.T                                                        # (P, R)
    rec = enc @ w_dec.reshape(C, R).T + b_dec[None, :]                       # (P, C)
    return rec.reshape(N, H, W, C).transpose(0, 3, 1, 2)


if __name__ == "__main__":
    # Small shapes consistent with the module (many channels >> few reduced).
    N, C, H, W = 2, 64, 16, 16
    R = 3

    key = jax.random.PRNGKey(0)
    k_x, k_mu, k_sig, k_w, k_b = jax.random.split(key, 5)

    x = jax.random.normal(k_x, (N, C, H, W), dtype=jnp.float32)

    # Deterministic synthetic parameter init (no checkpoint load).
    means = jnp.linspace(0.1, 0.9, R).astype(jnp.float32) \
            + 0.01 * jax.random.normal(k_mu, (R,), dtype=jnp.float32)
    sigmas = 0.15 + 0.05 * jax.random.uniform(k_sig, (R,), dtype=jnp.float32)
    w_dec = 0.1 * jax.random.normal(k_w, (C, R, 1, 1), dtype=jnp.float32)
    b_dec = 0.1 * jax.random.normal(k_b, (C,), dtype=jnp.float32)

    ref = _reference_forward(x, means, sigmas, w_dec, b_dec)

    # Primary (auto-selected) path: fused single-matmul kernel at C=64.
    out = gaussian_autoencoder_forward(x, means, sigmas, w_dec, b_dec)
    out = jax.block_until_ready(out)
    assert out.shape == (N, C, H, W), out.shape
    assert jnp.allclose(out, ref, atol=1e-4, rtol=1e-4), "fused path mismatch"

    # Switchable low-rank two-step path (used automatically for very large C).
    out_lr = gaussian_autoencoder_forward(x, means, sigmas, w_dec, b_dec,
                                          force_path="lowrank")
    out_lr = jax.block_until_ready(out_lr)
    assert jnp.allclose(out_lr, ref, atol=1e-4, rtol=1e-4), "lowrank path mismatch"

    print("KERNEL_OK")
</pallas_src>

<mosaic_0001>
module attributes {stable_mosaic.version = 11 : i64} {
  func.func @_fused_ae_kernel(%arg0: i32, %arg1: i32, %arg2: memref<2x64x256xf32, #tpu.memory_space<vmem>>, %arg3: memref<64x64xf32, #tpu.memory_space<vmem>>, %arg4: memref<64x1xf32, #tpu.memory_space<vmem>>, %arg5: memref<2x64x256xf32, #tpu.memory_space<vmem>>) attributes {dimension_semantics = [#tpu.dimension_semantics<parallel>, #tpu.dimension_semantics<parallel>], iteration_bounds = array<i64: 1, 1>, scalar_prefetch = 0 : i64, scratch_operands = 0 : i64, tpu.core_type = #tpu.core_type<tc>, window_params = [{transform_indices = @transform_0, window_bounds = array<i64: 2, 64, 256>}, {pipeline_mode = #tpu.pipeline_mode<synchronous>, transform_indices = @transform_1, window_bounds = array<i64: 64, 64>}, {pipeline_mode = #tpu.pipeline_mode<synchronous>, transform_indices = @transform_2, window_bounds = array<i64: 64, 1>}, {transform_indices = @transform_3, window_bounds = array<i64: 2, 64, 256>}]} {
    %c0 = arith.constant 0 : index
    %c0_0 = arith.constant 0 : index
    %0 = vector.load %arg3[%c0, %c0_0] : memref<64x64xf32, #tpu.memory_space<vmem>>, vector<64x64xf32>
    %c0_1 = arith.constant 0 : index
    %c0_2 = arith.constant 0 : index
    %1 = vector.load %arg4[%c0_1, %c0_2] : memref<64x1xf32, #tpu.memory_space<vmem>>, vector<64x1xf32>
    %c0_3 = arith.constant 0 : index
    %c0_4 = arith.constant 0 : index
    %c0_5 = arith.constant 0 : index
    %2 = vector.load %arg2[%c0_3, %c0_4, %c0_5] : memref<2x64x256xf32, #tpu.memory_space<vmem>>, vector<1x64x256xf32>
    %3 = vector.shape_cast %2 : vector<1x64x256xf32> to vector<64x256xf32>
    %cst = arith.constant dense<0.000000e+00> : vector<64x256xf32>
    %4 = tpu.matmul %0, %3, %cst {dimension_numbers = #tpu.dot_dimension_numbers<[1], [0], [0], [1], [0, 0, 1, 1], [], []>} : vector<64x64xf32>, vector<64x256xf32>, vector<64x256xf32> -> vector<64x256xf32>
    %5 = vector.broadcast %1 : vector<64x1xf32> to vector<64x256xf32>
    %6 = arith.addf %4, %5 : vector<64x256xf32>
    %c0_6 = arith.constant 0 : index
    %c0_7 = arith.constant 0 : index
    %c0_8 = arith.constant 0 : index
    %7 = vector.load %arg5[%c0_6, %c0_7, %c0_8] : memref<2x64x256xf32, #tpu.memory_space<vmem>>, vector<1x64x256xf32>
    %8 = vector.shape_cast %7 : vector<1x64x256xf32> to vector<64x256xf32>
    %9 = vector.shape_cast %6 : vector<64x256xf32> to vector<1x64x256xf32>
    tpu.vector_store %arg5[%c0_6, %c0_7, %c0_8], %9 {strides = array<i32>} : memref<2x64x256xf32, #tpu.memory_space<vmem>>, vector<1x64x256xf32>,
    %c1 = arith.constant 1 : index
    %c0_9 = arith.constant 0 : index
    %c0_10 = arith.constant 0 : index
    %10 = vector.load %arg2[%c1, %c0_9, %c0_10] : memref<2x64x256xf32, #tpu.memory_space<vmem>>, vector<1x64x256xf32>
    %11 = vector.shape_cast %10 : vector<1x64x256xf32> to vector<64x256xf32>
    %cst_11 = arith.constant dense<0.000000e+00> : vector<64x256xf32>
    %12 = tpu.matmul %0, %11, %cst_11 {dimension_numbers = #tpu.dot_dimension_numbers<[1], [0], [0], [1], [0, 0, 1, 1], [], []>} : vector<64x64xf32>, vector<64x256xf32>, vector<64x256xf32> -> vector<64x256xf32>
    %13 = vector.broadcast %1 : vector<64x1xf32> to vector<64x256xf32>
    %14 = arith.addf %12, %13 : vector<64x256xf32>
    %c1_12 = arith.constant 1 : index
    %c0_13 = arith.constant 0 : index
    %c0_14 = arith.constant 0 : index
    %15 = vector.load %arg5[%c1_12, %c0_13, %c0_14] : memref<2x64x256xf32, #tpu.memory_space<vmem>>, vector<1x64x256xf32>
    %16 = vector.shape_cast %15 : vector<1x64x256xf32> to vector<64x256xf32>
    %17 = vector.shape_cast %14 : vector<64x256xf32> to vector<1x64x256xf32>
    tpu.vector_store %arg5[%c1_12, %c0_13, %c0_14], %17 {strides = array<i32>} : memref<2x64x256xf32, #tpu.memory_space<vmem>>, vector<1x64x256xf32>,
    return
  }
  func.func @transform_0(%arg0: i32, %arg1: i32) -> (i32, i32, i32) {
    %c0_i32 = arith.constant 0 : i32
    %c0_i32_0 = arith.constant 0 : i32
    return %arg0, %c0_i32, %arg1 : i32, i32, i32
  }
  func.func @transform_1(%arg0: i32, %arg1: i32) -> (i32, i32) {
    %c0_i32 = arith.constant 0 : i32
    %c0_i32_0 = arith.constant 0 : i32
    %c0_i32_1 = arith.constant 0 : i32
    return %c0_i32, %c0_i32_0 : i32, i32
  }
  func.func @transform_2(%arg0: i32, %arg1: i32) -> (i32, i32) {
    %c0_i32 = arith.constant 0 : i32
    %c0_i32_0 = arith.constant 0 : i32
    %c0_i32_1 = arith.constant 0 : i32
    return %c0_i32, %c0_i32_0 : i32, i32
  }
  func.func @transform_3(%arg0: i32, %arg1: i32) -> (i32, i32, i32) {
    %c0_i32 = arith.constant 0 : i32
    %c0_i32_0 = arith.constant 0 : i32
    return %arg0, %c0_i32, %arg1 : i32, i32, i32
  }
}

</mosaic_0001>

<bundles_post_ra>
// kernel: tpu_custom_call.1
= control target key start
LH: loop header
LB: loop body
LE: loop exit
PB: predicated region body
PF: predicated region fallthrough
CT: control target
= control target key end

     0   :  { %8 = vsyncpa [#allocation3], 0  ;;  %s605_s0 = inlined_call_operand.hbm [shape: f32[2,64,256], index: 0, kind: input, shape index: {}]   ;;  %s606_s1 = inlined_call_operand.vmem [shape: f32[64,64], index: 1, kind: input, shape index: {}]   ;;  %s607_s2 = inlined_call_operand.vmem [shape: f32[64,1], index: 2, kind: input, shape index: {}]   ;;  %s608_s3 = inlined_call_operand.hbm [shape: f32[2,64,256], index: 3, kind: output, shape index: {}]  }
   0x1   :  { %9 = vsyncpa [#allocation4], 0  ;;  %s487_s12 = smov [#allocation2]  }
   0x2   :  { %s15_s13 = sshll.u32 %s487_s12, 4  ;;  %s16_s13 = int_to_ptr.vmem [resolvable:$true] %s15_s13 }
   0x3   :  { %s451_s14 = scalar_lea.vmem %s16_s13, 4096  ;;  %p456_p1 = scmp.lt.s32.totalorder %s16_s13, %s16_s13 }
   0x4   :  { %p452_p0 = scmp.ne.s32.totalorder %s16_s13, %s451_s14  ;;  %p457_p2 = scmp.lt.s32.totalorder %s451_s14, %s451_s14 }
   0x6   :  { %p458_p3 = por %p457_p2, %p456_p1 }
   0x8   :  { %p459_p4 = pnand %p458_p3, %p452_p0 }
   0xa   :  { %462 = shalt.err (!%p459_p4)
}
   0xb   :  { %s488_s15 = smov 256   ;;  %s489_s16 = smov 16  }
   0xc   :  { %21 = dma.hbm_to_vmem [thread:$0]  %s605_s0, 4096, %s16_s13, [#allocation3], %s488_s15, %s488_s15, %s489_s16  }
   0xd   :  { %483 = dma.done.wait [#allocation3], 4096  }
   0xe   :  { %484 = vsyncadd [#allocation3], 4294963200  ;;  %v490_v0 = vmov 0.0   ;;  %v491_v1 = vmov 0   ;;  %v60_v2 = vld [vmem:[#allocation2 + $0x78] sm:$0xff]  ;;  %v59_v4 = vld [vmem:[#allocation2 + $0x70] sm:$0xff] }
   0xf   :  { %190 = vmatprep.mubr.f32.mxu0 %v490_v0  ;;  %336 = vmatprep.mubr.f32.mxu1 %v490_v0  ;;  %v271_v3 = vld [vmem:[#allocation2 + $0xf8] sm:$0xff]  ;;  %v270_v5 = vld [vmem:[#allocation2 + $0xf0] sm:$0xff]  ;;  %v58_v6 = vld [vmem:[#allocation2 + $0x68] sm:$0xff]  ;;  %vm101_vm0 = vcmask 523264  }
  0x10   :  { %441 = vset.pattern.permute.xlu0 %v491_v1  ;;  %442 = vset.pattern.permute.xlu1 %v491_v1  ;;  %v269_v7 = vld [vmem:[#allocation2 + $0xe8] sm:$0xff]  ;;  %v57_v8 = vld [vmem:[#allocation2 + $0x60] sm:$0xff]  ;;  %v56_v10 = vld [vmem:[#allocation2 + $0x58] sm:$0xff] }
  0x11   :  { %142 = vmatprep.subr.mxu0 %v60_v2  ;;  %288 = vmatprep.subr.mxu1 %v271_v3  ;;  %v268_v9 = vld [vmem:[#allocation2 + $0xe0] sm:$0xff]  ;;  %v267_v11 = vld [vmem:[#allocation2 + $0xd8] sm:$0xff]  ;;  %v55_v12 = vld [vmem:[#allocation2 + $0x50] sm:$0xff] }
  0x12   :  { %143 = vmatpush1.msra.mxu0 %v59_v4  ;;  %289 = vmatpush1.msra.mxu1 %v270_v5  ;;  %v266_v13 = vld [vmem:[#allocation2 + $0xd0] sm:$0xff]  ;;  %v54_v14 = vld [vmem:[#allocation2 + $0x48] sm:$0xff]  ;;  %v53_v16 = vld [vmem:[#allocation2 + $0x40] sm:$0xff] }
  0x13   :  { %144 = vmatprep.subr.mxu0 %v58_v6  ;;  %290 = vmatprep.subr.mxu1 %v269_v7  ;;  %v265_v15 = vld [vmem:[#allocation2 + $0xc8] sm:$0xff]  ;;  %v264_v17 = vld [vmem:[#allocation2 + $0xc0] sm:$0xff]  ;;  %v52_v18 = vld [vmem:[#allocation2 + $0x38] sm:$0xff] }
  0x14   :  { %145 = vmatpush1.msra.mxu0 %v57_v8  ;;  %291 = vmatpush1.msra.mxu1 %v268_v9  ;;  %v263_v19 = vld [vmem:[#allocation2 + $0xb8] sm:$0xff]  ;;  %v51_v20 = vld [vmem:[#allocation2 + $0x30] sm:$0xff]  ;;  %v50_v22 = vld [vmem:[#allocation2 + $0x28] sm:$0xff] }
  0x15   :  { %146 = vmatprep.subr.mxu0 %v56_v10  ;;  %292 = vmatprep.subr.mxu1 %v267_v11  ;;  %v262_v21 = vld [vmem:[#allocation2 + $0xb0] sm:$0xff]  ;;  %v261_v23 = vld [vmem:[#allocation2 + $0xa8] sm:$0xff]  ;;  %v49_v24 = vld [vmem:[#allocation2 + $0x20] sm:$0xff] }
  0x16   :  { %147 = vmatpush1.msra.mxu0 %v55_v12  ;;  %293 = vmatpush1.msra.mxu1 %v266_v13  ;;  %v260_v25 = vld [vmem:[#allocation2 + $0xa0] sm:$0xff]  ;;  %v48_v26 = vld [vmem:[#allocation2 + $0x18] sm:$0xff]  ;;  %v47_v28 = vld [vmem:[#allocation2 + $0x10] sm:$0xff] }
  0x17   :  { %148 = vmatprep.subr.mxu0 %v54_v14  ;;  %294 = vmatprep.subr.mxu1 %v265_v15  ;;  %v259_v27 = vld [vmem:[#allocation2 + $0x98] sm:$0xff]  ;;  %v258_v29 = vld [vmem:[#allocation2 + $0x90] sm:$0xff]  ;;  %v46_v30 = vld [vmem:[#allocation2 + $0x8] sm:$0xff] }
  0x18   :  { %149 = vmatpush1.msra.mxu0 %v53_v16  ;;  %295 = vmatpush1.msra.mxu1 %v264_v17  ;;  %v257_v31 = vld [vmem:[#allocation2 + $0x88] sm:$0xff]  ;;  %v45_v32 = vld [vmem:[#allocation2] sm:$0xff]  ;;  %v39_v36 = vld [vmem:[%s607_s2 + $0x10] sm:$0xff] }
  0x19   :  { %150 = vmatprep.subr.mxu0 %v52_v18  ;;  %296 = vmatprep.subr.mxu1 %v263_v19  ;;  %v256_v33 = vld [vmem:[#allocation2 + $0x80] sm:$0xff]  ;;  %v30_v37 = vld [vmem:[%s606_s1 + $0x8] sm:$0xff]  ;;  %v40_v39 = vld [vmem:[%s607_s2 + $0x18] sm:$0xff] }
  0x1a   :  { %151 = vmatpush1.msra.mxu0 %v51_v20  ;;  %297 = vmatpush1.msra.mxu1 %v262_v21  ;;  %v29_v34 = vld [vmem:[%s606_s1] sm:$0xff]  ;;  %v38_v38 = vld [vmem:[%s607_s2 + $0x8] sm:$0xff]  ;;  %v31_v40 = vld [vmem:[%s606_s1 + $0x10] sm:$0xff] }
  0x1b   :  { %152 = vmatprep.subr.mxu0 %v50_v22  ;;  %298 = vmatprep.subr.mxu1 %v261_v23  ;;  %v37_v35 = vld [vmem:[%s607_s2] sm:$0xff]  ;;  %v42_v41 = vld [vmem:[%s607_s2 + $0x28] sm:$0xff]  ;;  %v32_v43 = vld [vmem:[%s606_s1 + $0x18] sm:$0xff] }
  0x1c   :  { %153 = vmatpush1.msra.mxu0 %v49_v24  ;;  %299 = vmatpush1.msra.mxu1 %v260_v25  ;;  %v41_v42 = vld [vmem:[%s607_s2 + $0x20] sm:$0xff]  ;;  %v44_v44 = vld [vmem:[%s607_s2 + $0x38] sm:$0xff]  ;;  %v43_v45 = vld [vmem:[%s607_s2 + $0x30] sm:$0xff] }
  0x1d   :  { %154 = vmatprep.subr.mxu0 %v48_v26  ;;  %300 = vmatprep.subr.mxu1 %v259_v27  ;;  %v33_v46 = vld [vmem:[%s606_s1 + $0x20] sm:$0xff]  ;;  %v34_v47 = vld [vmem:[%s606_s1 + $0x28] sm:$0xff]  ;;  %v35_v48 = vld [vmem:[%s606_s1 + $0x30] sm:$0xff] }
  0x1e   :  { %155 = vmatpush1.msra.mxu0 %v47_v28  ;;  %301 = vmatpush1.msra.mxu1 %v258_v29  ;;  %v36_v49 = vld [vmem:[%s606_s1 + $0x38] sm:$0xff]  ;;  %s492_s1 = smov [#allocation5]  }
  0x1f   :  { %156 = vmatprep.subr.mxu0 %v46_v30  ;;  %302 = vmatprep.subr.mxu1 %v257_v31  ;;  %s407_s23 = sshll.u32 %s492_s1, 4  ;;  %s408_s23 = int_to_ptr.vmem [resolvable:$true] %s407_s23 }
  0x20   :  { %157 = vmatpush1.msra.mxu0 %v45_v32  ;;  %303 = vmatpush1.msra.mxu1 %v256_v33  ;;  %s463_s24 = scalar_lea.vmem %s408_s23, 4096  ;;  %p468_p6 = scmp.lt.s32.totalorder %s408_s23, %s408_s23 }
  0x21   :  { %419 = vmatmul.mubr.msk.f32.vlgmr.msra.gmra.mxu0 %vm101_vm0, %v29_v34  ;;  %427 = vmatmul.mubr.msk.f32.vlgmr.msra.gmra.mxu1 %vm101_vm0, %v29_v34  ;;  %p464_p5 = scmp.ne.s32.totalorder %s408_s23, %s463_s24  ;;  %p469_p7 = scmp.lt.s32.totalorder %s463_s24, %s463_s24 }
  0x22   :  { %196 = vmatprep.mubr.f32.mxu0 %v490_v0  ;;  %342 = vmatprep.mubr.f32.mxu1 %v490_v0 }
  0x23   :  { %63 = vperm.xlu0 %441, %v37_v35   ;;  %73 = vperm.xlu1 %442, %v39_v36   ;;  %p470_p8 = por %p469_p7, %p468_p6 }
  0x25   :  { %420 = vmatmul.mubr.msk.f32.gmra.mxu0 %vm101_vm0, %v30_v37  ;;  %428 = vmatmul.mubr.msk.f32.gmra.mxu1 %vm101_vm0, %v30_v37  ;;  %p471_p9 = pnand %p470_p8, %p464_p5 }
  0x26   :  { %202 = vmatprep.mubr.f32.mxu0 %v490_v0  ;;  %348 = vmatprep.mubr.f32.mxu1 %v490_v0 }
  0x27   :  { %68 = vperm.xlu0 %441, %v38_v38   ;;  %78 = vperm.xlu1 %442, %v40_v39  }
  0x29   :  { %421 = vmatmul.mubr.msk.f32.gmra.mxu0 %vm101_vm0, %v31_v40  ;;  %429 = vmatmul.mubr.msk.f32.gmra.mxu1 %vm101_vm0, %v31_v40 }
  0x2a   :  { %208 = vmatprep.mubr.f32.mxu0 %v490_v0  ;;  %354 = vmatprep.mubr.f32.mxu1 %v490_v0 }
  0x2b   :  { %88 = vperm.xlu1 %442, %v42_v41   ;;  %83 = vperm.xlu0 %441, %v41_v42  }
  0x2d   :  { %422 = vmatmul.mubr.msk.f32.gmra.mxu0 %vm101_vm0, %v32_v43  ;;  %430 = vmatmul.mubr.msk.f32.gmra.mxu1 %vm101_vm0, %v32_v43 }
  0x2e   :  { %214 = vmatprep.mubr.f32.mxu0 %v490_v0  ;;  %360 = vmatprep.mubr.f32.mxu1 %v490_v0 }
  0x2f   :  { %98 = vperm.xlu1 %442, %v44_v44   ;;  %93 = vperm.xlu0 %441, %v43_v45  }
  0x31   :  { %423 = vmatmul.mubr.msk.f32.gmra.mxu0 %vm101_vm0, %v33_v46  ;;  %431 = vmatmul.mubr.msk.f32.gmra.mxu1 %vm101_vm0, %v33_v46 }
  0x32   :  { %220 = vmatprep.mubr.f32.mxu0 %v490_v0  ;;  %366 = vmatprep.mubr.f32.mxu1 %v490_v0 }
  0x35   :  { %424 = vmatmul.mubr.msk.f32.gmra.mxu0 %vm101_vm0, %v34_v47  ;;  %432 = vmatmul.mubr.msk.f32.gmra.mxu1 %vm101_vm0, %v34_v47 }
  0x36   :  { %226 = vmatprep.mubr.f32.mxu0 %v490_v0  ;;  %372 = vmatprep.mubr.f32.mxu1 %v490_v0 }
  0x39   :  { %425 = vmatmul.mubr.msk.f32.gmra.mxu0 %vm101_vm0, %v35_v48  ;;  %433 = vmatmul.mubr.msk.f32.gmra.mxu1 %vm101_vm0, %v35_v48 }
  0x3a   :  { %232 = vmatprep.mubr.f32.mxu0 %v490_v0  ;;  %378 = vmatprep.mubr.f32.mxu1 %v490_v0 }
  0x3d   :  { %426 = vmatmul.mubr.msk.f32.gmra.mxu0 %vm101_vm0, %v36_v49  ;;  %434 = vmatmul.mubr.msk.f32.gmra.mxu1 %vm101_vm0, %v36_v49 }
  0x9e   :  { %v64_v50 = vpop.permute.xlu0 %63  ;;  %v74_v0 = vpop.permute.xlu1 %73 }
  0xa2   :  { %v69_v55 = vpop.permute.xlu0 %68  ;;  %v79_v11 = vpop.permute.xlu1 %78 }
  0xa6   :  { %v84_v20 = vpop.permute.xlu0 %83  ;;  %v89_v29 = vpop.permute.xlu1 %88 }
  0xaa   :  { %v94_v38 = vpop.permute.xlu0 %93  ;;  %v99_v47 = vpop.permute.xlu1 %98 }
  0xe1   :  { %v192_v51 = vpop.f32.mrf.mxu0  ;;  %v338_v52 = vpop.f32.mrf.mxu1 }
  0xe2   :  { %v193_v53 = vadd.f32 %v192_v51, %v64_v50  ;;  %v339_v54 = vadd.f32 %v338_v52, %v64_v50 }
  0xe3   :  { %v194_v56 = vpop.f32.mrf.mxu0  ;;  %v340_v57 = vpop.f32.mrf.mxu1 }
  0xe4   :  { %239 = vst [vmem:[#allocation5] sm:$0xff] %v193_v53  ;;  %386 = vst [vmem:[#allocation5 + $0x80] sm:$0xff] %v339_v54  ;;  %v195_v58 = vadd.f32 %v194_v56, %v64_v50  ;;  %v341_v59 = vadd.f32 %v340_v57, %v64_v50 }
  0xe5   :  { %v198_v60 = vpop.f32.mrf.mxu0  ;;  %v344_v61 = vpop.f32.mrf.mxu1 }
  0xe6   :  { %240 = vst [vmem:[#allocation5 + $0x8] sm:$0xff] %v195_v58  ;;  %387 = vst [vmem:[#allocation5 + $0x88] sm:$0xff] %v341_v59  ;;  %v199_v62 = vadd.f32 %v198_v60, %v69_v55  ;;  %v345_v63 = vadd.f32 %v344_v61, %v69_v55 }
  0xe7   :  { %v200_v1 = vpop.f32.mrf.mxu0  ;;  %v346_v2 = vpop.f32.mrf.mxu1 }
  0xe8   :  { %241 = vst [vmem:[#allocation5 + $0x10] sm:$0xff] %v199_v62  ;;  %388 = vst [vmem:[#allocation5 + $0x90] sm:$0xff] %v345_v63  ;;  %v201_v3 = vadd.f32 %v200_v1, %v69_v55  ;;  %v347_v4 = vadd.f32 %v346_v2, %v69_v55 }
  0xe9   :  { %v204_v5 = vpop.f32.mrf.mxu0  ;;  %v350_v6 = vpop.f32.mrf.mxu1 }
  0xea   :  { %242 = vst [vmem:[#allocation5 + $0x18] sm:$0xff] %v201_v3  ;;  %389 = vst [vmem:[#allocation5 + $0x98] sm:$0xff] %v347_v4  ;;  %v205_v7 = vadd.f32 %v204_v5, %v74_v0  ;;  %v351_v8 = vadd.f32 %v350_v6, %v74_v0 }
  0xeb   :  { %v206_v9 = vpop.f32.mrf.mxu0  ;;  %v352_v10 = vpop.f32.mrf.mxu1 }
  0xec   :  { %243 = vst [vmem:[#allocation5 + $0x20] sm:$0xff] %v205_v7  ;;  %390 = vst [vmem:[#allocation5 + $0xa0] sm:$0xff] %v351_v8  ;;  %v207_v12 = vadd.f32 %v206_v9, %v74_v0  ;;  %v353_v13 = vadd.f32 %v352_v10, %v74_v0 }
  0xed   :  { %v210_v14 = vpop.f32.mrf.mxu0  ;;  %v356_v15 = vpop.f32.mrf.mxu1 }
  0xee   :  { %244 = vst [vmem:[#allocation5 + $0x28] sm:$0xff] %v207_v12  ;;  %391 = vst [vmem:[#allocation5 + $0xa8] sm:$0xff] %v353_v13  ;;  %v211_v16 = vadd.f32 %v210_v14, %v79_v11  ;;  %v357_v17 = vadd.f32 %v356_v15, %v79_v11 }
  0xef   :  { %v212_v18 = vpop.f32.mrf.mxu0  ;;  %v358_v19 = vpop.f32.mrf.mxu1 }
  0xf0   :  { %245 = vst [vmem:[#allocation5 + $0x30] sm:$0xff] %v211_v16  ;;  %392 = vst [vmem:[#allocation5 + $0xb0] sm:$0xff] %v357_v17  ;;  %v213_v21 = vadd.f32 %v212_v18, %v79_v11  ;;  %v359_v22 = vadd.f32 %v358_v19, %v79_v11 }
  0xf1   :  { %v216_v23 = vpop.f32.mrf.mxu0  ;;  %v362_v24 = vpop.f32.mrf.mxu1 }
  0xf2   :  { %246 = vst [vmem:[#allocation5 + $0x38] sm:$0xff] %v213_v21  ;;  %393 = vst [vmem:[#allocation5 + $0xb8] sm:$0xff] %v359_v22  ;;  %v217_v25 = vadd.f32 %v216_v23, %v84_v20  ;;  %v363_v26 = vadd.f32 %v362_v24, %v84_v20 }
  0xf3   :  { %v218_v27 = vpop.f32.mrf.mxu0  ;;  %v364_v28 = vpop.f32.mrf.mxu1 }
  0xf4   :  { %247 = vst [vmem:[#allocation5 + $0x40] sm:$0xff] %v217_v25  ;;  %394 = vst [vmem:[#allocation5 + $0xc0] sm:$0xff] %v363_v26  ;;  %v219_v30 = vadd.f32 %v218_v27, %v84_v20  ;;  %v365_v31 = vadd.f32 %v364_v28, %v84_v20 }
  0xf5   :  { %v222_v32 = vpop.f32.mrf.mxu0  ;;  %v368_v33 = vpop.f32.mrf.mxu1 }
  0xf6   :  { %248 = vst [vmem:[#allocation5 + $0x48] sm:$0xff] %v219_v30  ;;  %395 = vst [vmem:[#allocation5 + $0xc8] sm:$0xff] %v365_v31  ;;  %v223_v34 = vadd.f32 %v222_v32, %v89_v29  ;;  %v369_v35 = vadd.f32 %v368_v33, %v89_v29 }
  0xf7   :  { %v224_v36 = vpop.f32.mrf.mxu0  ;;  %v370_v37 = vpop.f32.mrf.mxu1 }
  0xf8   :  { %249 = vst [vmem:[#allocation5 + $0x50] sm:$0xff] %v223_v34  ;;  %396 = vst [vmem:[#allocation5 + $0xd0] sm:$0xff] %v369_v35  ;;  %v225_v39 = vadd.f32 %v224_v36, %v89_v29  ;;  %v371_v40 = vadd.f32 %v370_v37, %v89_v29 }
  0xf9   :  { %v228_v41 = vpop.f32.mrf.mxu0  ;;  %v374_v42 = vpop.f32.mrf.mxu1 }
  0xfa   :  { %250 = vst [vmem:[#allocation5 + $0x58] sm:$0xff] %v225_v39  ;;  %397 = vst [vmem:[#allocation5 + $0xd8] sm:$0xff] %v371_v40  ;;  %v229_v43 = vadd.f32 %v228_v41, %v94_v38  ;;  %v375_v44 = vadd.f32 %v374_v42, %v94_v38 }
  0xfb   :  { %v230_v45 = vpop.f32.mrf.mxu0  ;;  %v376_v46 = vpop.f32.mrf.mxu1 }
  0xfc   :  { %251 = vst [vmem:[#allocation5 + $0x60] sm:$0xff] %v229_v43  ;;  %398 = vst [vmem:[#allocation5 + $0xe0] sm:$0xff] %v375_v44  ;;  %v231_v48 = vadd.f32 %v230_v45, %v94_v38  ;;  %v377_v49 = vadd.f32 %v376_v46, %v94_v38 }
  0xfd   :  { %v234_v50 = vpop.f32.mrf.mxu0  ;;  %v380_v51 = vpop.f32.mrf.mxu1 }
  0xfe   :  { %252 = vst [vmem:[#allocation5 + $0x68] sm:$0xff] %v231_v48  ;;  %399 = vst [vmem:[#allocation5 + $0xe8] sm:$0xff] %v377_v49  ;;  %v235_v52 = vadd.f32 %v234_v50, %v99_v47  ;;  %v381_v53 = vadd.f32 %v380_v51, %v99_v47 }
  0xff   :  { %v236_v54 = vpop.f32.mrf.mxu0  ;;  %v382_v55 = vpop.f32.mrf.mxu1 }
 0x100   :  { %253 = vst [vmem:[#allocation5 + $0x70] sm:$0xff] %v235_v52  ;;  %400 = vst [vmem:[#allocation5 + $0xf0] sm:$0xff] %v381_v53  ;;  %v237_v56 = vadd.f32 %v236_v54, %v99_v47  ;;  %v383_v57 = vadd.f32 %v382_v55, %v99_v47 }
 0x102   :  { %254 = vst [vmem:[#allocation5 + $0x78] sm:$0xff] %v237_v56  ;;  %401 = vst [vmem:[#allocation5 + $0xf8] sm:$0xff] %v383_v57 }
 0x103   :  { %474 = shalt.err (!%p471_p9)
}
 0x104   :  { %413 = dma.vmem_to_hbm [thread:$0]  %s408_s23, 4096, %s608_s3, [#allocation4], %s488_s15, %s488_s15, %s489_s16  }
 0x105   :  { %485 = dma.done.wait [#allocation4], 4096  }
 0x106   :  { %486 = vsyncadd [#allocation4], 4294963200 }
 0x107   :  { %417 = vsyncpa [#allocation3], 1 }
 0x108   :  { %418 = vsyncpa [#allocation4], 1 }

</bundles_post_ra>
